<compile_context>
chip_gen: v7x
topology: tpu7x:2x2x1
jax: 0.10.0
libtpu: 0.0.40
codegen_flags: <defaults>
</compile_context>

<pallas_src>
import numpy as np
import jax
import jax.numpy as jnp
from jax import lax
from jax.experimental import pallas as pl
from jax.experimental.pallas import tpu as pltpu


def _round_up(x, m):
    return ((x + m - 1) // m) * m


# ----------------------------------------------------------------------------
# Fused branch kernel
#   out[n,:] = self[n,:] @ Wself^T + segreduce_e((A_g Wa^T) * (X_g Wx^T))[n,:] @ Wagg^T
# ----------------------------------------------------------------------------
def _make_branch_kernel(n_tile, e_tile, num_e_blocks, reduce):
    def kernel(ptr_ref,                       # SMEM  (N_pad+1,) int32  (scalar prefetch)
               a_ref, x_ref,                  # VMEM  (e_tile, a_pad) / (e_tile, x_pad)
               wa_ref, wx_ref,                # VMEM  (a_pad, inner_pad) / (x_pad, inner_pad)
               lo_ref, hi_ref,                # VMEM  (n_tile, 1) int32 per-node edge range
               self_ref,                      # VMEM  (n_tile, inner_pad)
               ws_ref, wg_ref,                # VMEM  (inner_pad, out_pad)
               o_ref,                         # VMEM  (n_tile, out_pad)  output block
               acc_ref):                      # VMEM  scratch (n_tile, inner_pad) fp32
        n_i = pl.program_id(0)
        e_i = pl.program_id(1)

        @pl.when(e_i == 0)
        def _init():
            acc_ref[...] = jnp.zeros_like(acc_ref)

        # CSR contiguity: nodes of this N-tile only own edges in
        # [ptr[n0], ptr[n0 + n_tile]); skip non-overlapping E-blocks.
        n0 = n_i * n_tile
        seg_lo = ptr_ref[n0]
        seg_hi = ptr_ref[n0 + n_tile]
        blk_lo = e_i * e_tile
        blk_hi = blk_lo + e_tile
        overlap = jnp.logical_and(blk_lo < seg_hi, blk_hi > seg_lo)

        @pl.when(overlap)
        def _accumulate():
            att = jnp.dot(a_ref[...], wa_ref[...],
                          preferred_element_type=jnp.float32)
            val = jnp.dot(x_ref[...], wx_ref[...],
                          preferred_element_type=jnp.float32)
            agg = att * val                                        # (e_tile, inner_pad)
            # Segment-indicator tile built in-registers (never touches HBM).
            edge = blk_lo + lax.broadcasted_iota(jnp.int32, (n_tile, e_tile), 1)
            seg = jnp.logical_and(edge >= lo_ref[...],
                                  edge < hi_ref[...]).astype(jnp.float32)
            acc_ref[...] += jnp.dot(seg, agg, preferred_element_type=jnp.float32)

        @pl.when(e_i == num_e_blocks - 1)
        def _finalize():
            seg_out = acc_ref[...]
            if reduce == "mean":
                counts = jnp.maximum(
                    (hi_ref[...] - lo_ref[...]).astype(jnp.float32), 1.0)
                seg_out = seg_out / counts
            res = (jnp.dot(self_ref[...], ws_ref[...],
                           preferred_element_type=jnp.float32)
                   + jnp.dot(seg_out, wg_ref[...],
                             preferred_element_type=jnp.float32))
            o_ref[...] = res.astype(o_ref.dtype)   # act = identity

    return kernel


def _branch_call(a_gath, x_gath, wa, wx, ptr, self_embed, w_self, w_agg,
                 reduce="sum", n_tile=None, e_tile=None,
                 compute_dtype=jnp.float32):
    if reduce not in ("sum", "mean"):
        # TODO(synk): segment_csr reduce in {"min","max"} has no clean MXU form.
        raise NotImplementedError("only sum/mean segment reduces supported")

    e_true, a_dim = a_gath.shape
    x_dim = x_gath.shape[1]
    n_true, inner = self_embed.shape
    outdim = w_self.shape[0]

    # Lane-dense padding of every matmul dim (exact: zero padding on
    # contracted dims, padded output columns sliced off below).
    a_pad = _round_up(a_dim, 128)
    x_pad = _round_up(x_dim, 128)
    inner_pad = _round_up(inner, 128)
    out_pad = _round_up(outdim, 128)

    if n_tile is None:
        n_tile = min(256, _round_up(n_true, 8))
    if e_tile is None:
        e_tile = min(512, _round_up(max(e_true, 1), 128))
    n_padded = _round_up(n_true, n_tile)
    e_padded = _round_up(max(e_true, 1), e_tile)
    grid = (n_padded // n_tile, e_padded // e_tile)

    def pad2(arr, rows, cols, dtype):
        arr = arr.astype(dtype)
        return jnp.pad(arr, ((0, rows - arr.shape[0]), (0, cols - arr.shape[1])))

    a_g = pad2(a_gath, e_padded, a_pad, compute_dtype)
    x_g = pad2(x_gath, e_padded, x_pad, compute_dtype)
    wa_t = pad2(wa.T, a_pad, inner_pad, compute_dtype)        # pre-transposed once
    wx_t = pad2(wx.T, x_pad, inner_pad, compute_dtype)
    self_p = pad2(self_embed, n_padded, inner_pad, compute_dtype)
    ws_t = pad2(w_self.T, inner_pad, out_pad, compute_dtype)
    wg_t = pad2(w_agg.T, inner_pad, out_pad, compute_dtype)

    ptr = ptr.astype(jnp.int32)
    # Padded node rows get empty segments (lo == hi == ptr[-1]).
    ptr_pad = jnp.full((n_padded + 1,), ptr[-1], jnp.int32).at[: n_true + 1].set(ptr)
    lo2d = ptr_pad[:-1, None]           # (N_pad, 1) int32
    hi2d = ptr_pad[1:, None]            # (N_pad, 1) int32

    kernel = _make_branch_kernel(n_tile, e_tile, grid[1], reduce)

    grid_spec = pltpu.PrefetchScalarGridSpec(
        num_scalar_prefetch=1,          # ptr -> SMEM, available to index_maps too
        grid=grid,
        in_specs=[
            pl.BlockSpec((e_tile, a_pad), lambda n, e, p: (e, 0)),      # a_g
            pl.BlockSpec((e_tile, x_pad), lambda n, e, p: (e, 0)),      # x_g
            pl.BlockSpec((a_pad, inner_pad), lambda n, e, p: (0, 0)),   # wa^T
            pl.BlockSpec((x_pad, inner_pad), lambda n, e, p: (0, 0)),   # wx^T
            pl.BlockSpec((n_tile, 1), lambda n, e, p: (n, 0)),          # lo
            pl.BlockSpec((n_tile, 1), lambda n, e, p: (n, 0)),          # hi
            pl.BlockSpec((n_tile, inner_pad), lambda n, e, p: (n, 0)),  # self
            pl.BlockSpec((inner_pad, out_pad), lambda n, e, p: (0, 0)), # w_self^T
            pl.BlockSpec((inner_pad, out_pad), lambda n, e, p: (0, 0)), # w_agg^T
        ],
        out_specs=pl.BlockSpec((n_tile, out_pad), lambda n, e, p: (n, 0)),
        scratch_shapes=[pltpu.VMEM((n_tile, inner_pad), jnp.float32)],
    )

    grid_n, grid_e = grid
    flops = (2 * grid_n * grid_e * e_tile * inner_pad * (a_pad + x_pad + n_tile)
             + 4 * grid_n * n_tile * inner_pad * out_pad)
    bytes_accessed = 4 * (grid_n * e_padded * (a_pad + x_pad)
                          + (a_pad + x_pad) * inner_pad
                          + n_padded * (inner_pad + out_pad)
                          + 2 * inner_pad * out_pad
                          + 3 * (n_padded + 1))

    out = pl.pallas_call(
        kernel,
        out_shape=jax.ShapeDtypeStruct((n_padded, out_pad), jnp.float32),
        grid_spec=grid_spec,
        compiler_params=pltpu.CompilerParams(
            dimension_semantics=("parallel", "arbitrary"),
            vmem_limit_bytes=48 * 1024 * 1024),
        cost_estimate=pl.CostEstimate(flops=flops, transcendentals=0,
                                      bytes_accessed=bytes_accessed),
    )(ptr_pad, a_g, x_g, wa_t, wx_t, lo2d, hi2d, self_p, ws_t, wg_t)

    return out[:n_true, :outdim]


# ----------------------------------------------------------------------------
# Parameter init (Xavier-uniform, deterministic) — mirrors __init__
# ----------------------------------------------------------------------------
def _xavier_uniform(key, shape):
    fan_out, fan_in = shape
    limit = float(np.sqrt(6.0 / (fan_in + fan_out)))
    return jax.random.uniform(key, shape, jnp.float32, -limit, limit)


def init_aggregator2_params(key, t_dim, v_dim, a_dim, t_outdim, v_outdim, a_outdim):
    ks = jax.random.split(key, 7)
    # NOTE: the PyTorch __init__ xavier-initializes self.w1 but never declares
    # it; the forward pass implies shape (t_outdim, t_dim * 2).
    return dict(
        wv=_xavier_uniform(ks[0], (t_dim, v_dim)),
        wt=_xavier_uniform(ks[1], (v_dim, t_dim)),
        wa_t=_xavier_uniform(ks[2], (v_dim, a_dim)),
        w1=_xavier_uniform(ks[3], (t_outdim, t_dim * 2)),
        w2=_xavier_uniform(ks[4], (v_outdim, v_dim * 2)),
        wa=_xavier_uniform(ks[5], (a_dim, a_outdim)),
        wa_v=_xavier_uniform(ks[6], (t_dim, a_dim)),
    )


# ----------------------------------------------------------------------------
# Forward wrapper
# ----------------------------------------------------------------------------
def aggregator2_forward(params, t_info, v_info, t_embed, v_embed, a_embed,
                        name="sum", n_tile=None, e_tile=None):
    t_dim = params["wv"].shape[0]
    v_dim = params["wt"].shape[0]

    # TODO(synk): edge-row gathers are plain-JAX (XLA) gathers; an in-kernel
    # gather via scalar-prefetched index lists + manual DMA would remove one
    # HBM round trip per branch input.
    ptr_t, a_list_t, v_list_t = t_info
    a_g = jnp.take(a_embed, a_list_t, axis=0)                 # (E_t, a_dim)
    v_g = jnp.take(v_embed, v_list_t, axis=0)                 # (E_t, v_dim)
    w1_self = params["w1"][:, :t_dim]
    w1_agg = params["w1"][:, t_dim:]
    t_upd = _branch_call(a_g, v_g, params["wa_v"], params["wv"], ptr_t,
                         t_embed, w1_self, w1_agg, reduce=name,
                         n_tile=n_tile, e_tile=e_tile)

    ptr_v, a_list_v, t_list_v = v_info
    a_g2 = jnp.take(a_embed, a_list_v, axis=0)                # (E_v, a_dim)
    t_g2 = jnp.take(t_embed, t_list_v, axis=0)                # (E_v, t_dim)
    w2_self = params["w2"][:, :v_dim]
    w2_agg = params["w2"][:, v_dim:]
    v_upd = _branch_call(a_g2, t_g2, params["wa_t"], params["wt"], ptr_v,
                         v_embed, w2_self, w2_agg, reduce=name,
                         n_tile=n_tile, e_tile=e_tile)

    # Sub-MXU-tile projection: a dedicated pallas_call would be pure launch
    # overhead, so leave it to XLA (per perf review).
    a_out = jnp.dot(a_embed, params["wa"], preferred_element_type=jnp.float32)

    return t_upd, v_upd, a_out


# ----------------------------------------------------------------------------
# Pure-JAX reference (mirrors the PyTorch forward with act = identity)
# ----------------------------------------------------------------------------
def _segment_csr_ref(x, ptr, reduce):
    edges = jnp.arange(x.shape[0])
    seg = ((edges[None, :] >= ptr[:-1, None]) &
           (edges[None, :] < ptr[1:, None])).astype(x.dtype)
    out = seg @ x
    if reduce == "mean":
        out = out / jnp.maximum(seg.sum(axis=1, keepdims=True), 1.0)
    return out


def aggregator2_reference(params, t_info, v_info, t_embed, v_embed, a_embed, name="sum"):
    ptr_t, a_list_t, v_list_t = t_info
    value_embed = params["wv"] @ v_embed[v_list_t].T
    att_embed = params["wa_v"] @ a_embed[a_list_t].T
    agg = (att_embed * value_embed).T
    out = _segment_csr_ref(agg, ptr_t, name)
    t_upd = (params["w1"] @ jnp.concatenate([t_embed, out], axis=1).T).T

    ptr_v, a_list_v, t_list_v = v_info
    tuple_embed = params["wt"] @ t_embed[t_list_v].T
    att2 = params["wa_t"] @ a_embed[a_list_v].T
    agg2 = (att2 * tuple_embed).T
    out2 = _segment_csr_ref(agg2, ptr_v, name)
    v_upd = (params["w2"] @ jnp.concatenate([v_embed, out2], axis=1).T).T

    return t_upd, v_upd, a_embed @ params["wa"]


# ----------------------------------------------------------------------------
if __name__ == "__main__":
    key = jax.random.PRNGKey(0)

    # Small synthetic problem sizes.
    t_dim, v_dim, a_dim = 32, 32, 32
    t_outdim, v_outdim, a_outdim = 16, 16, 16
    n_t, n_v, n_a = 16, 16, 8        # node counts
    e_t, e_v = 48, 48                # edge counts per branch (3 edges / node)

    k_p, k1, k2, k3, k4, k5, k6, k7 = jax.random.split(key, 8)
    params = init_aggregator2_params(k_p, t_dim, v_dim, a_dim,
                                     t_outdim, v_outdim, a_outdim)

    t_embed = jax.random.normal(k1, (n_t, t_dim), jnp.float32)
    v_embed = jax.random.normal(k2, (n_v, v_dim), jnp.float32)
    a_embed = jax.random.normal(k3, (n_a, a_dim), jnp.float32)

    # CSR pointers: each node owns e/n consecutive edges.
    ptr_t = jnp.arange(0, e_t + 1, e_t // n_t, dtype=jnp.int32)
    ptr_v = jnp.arange(0, e_v + 1, e_v // n_v, dtype=jnp.int32)
    a_list_t = jax.random.randint(k4, (e_t,), 0, n_a, jnp.int32)
    v_list_t = jax.random.randint(k5, (e_t,), 0, n_v, jnp.int32)
    a_list_v = jax.random.randint(k6, (e_v,), 0, n_a, jnp.int32)
    t_list_v = jax.random.randint(k7, (e_v,), 0, n_t, jnp.int32)

    t_info = (ptr_t, a_list_t, v_list_t)
    v_info = (ptr_v, a_list_v, t_list_v)

    refs = aggregator2_reference(params, t_info, v_info,
                                 t_embed, v_embed, a_embed, name="sum")

    # 1) Default (auto) tiling: single block per axis at these toy sizes.
    outs = aggregator2_forward(params, t_info, v_info,
                               t_embed, v_embed, a_embed, name="sum")
    outs = jax.block_until_ready(outs)
    for o, r in zip(outs, refs):
        np.testing.assert_allclose(np.asarray(o), np.asarray(r),
                                   rtol=1e-4, atol=1e-4)

    # 2) Forced small tiles -> multi-block (2 x 3) grid: exercises the
    #    E-reduction accumulator, pl.when init/finalize and the CSR block skip.
    outs2 = aggregator2_forward(params, t_info, v_info,
                                t_embed, v_embed, a_embed, name="sum",
                                n_tile=8, e_tile=16)
    outs2 = jax.block_until_ready(outs2)
    for o, r in zip(outs2, refs):
        np.testing.assert_allclose(np.asarray(o), np.asarray(r),
                                   rtol=1e-4, atol=1e-4)

    print("KERNEL_OK")
</pallas_src>

<mosaic_0001>
module attributes {stable_mosaic.version = 11 : i64} {
  func.func @kernel(%arg0: i32, %arg1: i32, %arg2: memref<17xi32, #tpu.memory_space<smem>>, %arg3: memref<128x128xf32, #tpu.memory_space<vmem>>, %arg4: memref<128x128xf32, #tpu.memory_space<vmem>>, %arg5: memref<128x128xf32, #tpu.memory_space<vmem>>, %arg6: memref<128x128xf32, #tpu.memory_space<vmem>>, %arg7: memref<16x1xi32, #tpu.memory_space<vmem>>, %arg8: memref<16x1xi32, #tpu.memory_space<vmem>>, %arg9: memref<16x128xf32, #tpu.memory_space<vmem>>, %arg10: memref<128x128xf32, #tpu.memory_space<vmem>>, %arg11: memref<128x128xf32, #tpu.memory_space<vmem>>, %arg12: memref<16x128xf32, #tpu.memory_space<vmem>>, %arg13: memref<16x128xf32, #tpu.memory_space<vmem>>) attributes {dimension_semantics = [#tpu.dimension_semantics<parallel>, #tpu.dimension_semantics<arbitrary>], iteration_bounds = array<i64: 1, 1>, scalar_prefetch = 1 : i64, scratch_operands = 1 : i64, tpu.core_type = #tpu.core_type<tc>, window_params = [{transform_indices = @transform_0, window_bounds = array<i64: 128, 128>}, {transform_indices = @transform_1, window_bounds = array<i64: 128, 128>}, {pipeline_mode = #tpu.pipeline_mode<synchronous>, transform_indices = @transform_2, window_bounds = array<i64: 128, 128>}, {pipeline_mode = #tpu.pipeline_mode<synchronous>, transform_indices = @transform_3, window_bounds = array<i64: 128, 128>}, {transform_indices = @transform_4, window_bounds = array<i64: 16, 1>}, {transform_indices = @transform_5, window_bounds = array<i64: 16, 1>}, {transform_indices = @transform_6, window_bounds = array<i64: 16, 128>}, {pipeline_mode = #tpu.pipeline_mode<synchronous>, transform_indices = @transform_7, window_bounds = array<i64: 128, 128>}, {pipeline_mode = #tpu.pipeline_mode<synchronous>, transform_indices = @transform_8, window_bounds = array<i64: 128, 128>}, {transform_indices = @transform_9, window_bounds = array<i64: 16, 128>}]} {
    %c0_i32 = arith.constant 0 : i32
    %0 = arith.cmpi eq, %arg1, %c0_i32 : i32
    %1 = arith.extui %0 : i1 to i32
    %c0_i32_0 = arith.constant 0 : i32
    %2 = arith.cmpi ne, %1, %c0_i32_0 : i32
    scf.if %2 {
      %cst = arith.constant 0.000000e+00 : f32
      %19 = vector.broadcast %cst : f32 to vector<16x128xf32>
      %c0 = arith.constant 0 : index
      %c0_6 = arith.constant 0 : index
      %20 = vector.load %arg13[%c0, %c0_6] : memref<16x128xf32, #tpu.memory_space<vmem>>, vector<16x128xf32>
      tpu.vector_store %arg13[%c0, %c0_6], %19 {strides = array<i32>} : memref<16x128xf32, #tpu.memory_space<vmem>>, vector<16x128xf32>,
    } else {
    }
    %c16_i32 = arith.constant 16 : i32
    %3 = arith.muli %arg0, %c16_i32 : i32
    %4 = arith.index_cast %3 : i32 to index
    %5 = memref.load %arg2[%4] : memref<17xi32, #tpu.memory_space<smem>>
    %c16_i32_1 = arith.constant 16 : i32
    %6 = arith.addi %3, %c16_i32_1 : i32
    %7 = arith.index_cast %6 : i32 to index
    %8 = memref.load %arg2[%7] : memref<17xi32, #tpu.memory_space<smem>>
    %c128_i32 = arith.constant 128 : i32
    %9 = arith.muli %arg1, %c128_i32 : i32
    %c128_i32_2 = arith.constant 128 : i32
    %10 = arith.addi %9, %c128_i32_2 : i32
    %11 = arith.cmpi slt, %9, %8 : i32
    %12 = arith.cmpi sgt, %10, %5 : i32
    %13 = arith.andi %11, %12 : i1
    %14 = arith.extui %13 : i1 to i32
    %c0_i32_3 = arith.constant 0 : i32
    %15 = arith.cmpi ne, %14, %c0_i32_3 : i32
    scf.if %15 {
      %c0 = arith.constant 0 : index
      %c0_6 = arith.constant 0 : index
      %19 = vector.load %arg3[%c0, %c0_6] : memref<128x128xf32, #tpu.memory_space<vmem>>, vector<128x128xf32>
      %c0_7 = arith.constant 0 : index
      %c0_8 = arith.constant 0 : index
      %20 = vector.load %arg5[%c0_7, %c0_8] : memref<128x128xf32, #tpu.memory_space<vmem>>, vector<128x128xf32>
      %cst = arith.constant dense<0.000000e+00> : vector<128x128xf32>
      %21 = tpu.matmul %19, %20, %cst {dimension_numbers = #tpu.dot_dimension_numbers<[1], [0], [0], [1], [0, 0, 1, 1], [], []>} : vector<128x128xf32>, vector<128x128xf32>, vector<128x128xf32> -> vector<128x128xf32>
      %c0_9 = arith.constant 0 : index
      %c0_10 = arith.constant 0 : index
      %22 = vector.load %arg4[%c0_9, %c0_10] : memref<128x128xf32, #tpu.memory_space<vmem>>, vector<128x128xf32>
      %c0_11 = arith.constant 0 : index
      %c0_12 = arith.constant 0 : index
      %23 = vector.load %arg6[%c0_11, %c0_12] : memref<128x128xf32, #tpu.memory_space<vmem>>, vector<128x128xf32>
      %cst_13 = arith.constant dense<0.000000e+00> : vector<128x128xf32>
      %24 = tpu.matmul %22, %23, %cst_13 {dimension_numbers = #tpu.dot_dimension_numbers<[1], [0], [0], [1], [0, 0, 1, 1], [], []>} : vector<128x128xf32>, vector<128x128xf32>, vector<128x128xf32> -> vector<128x128xf32>
      %25 = arith.mulf %21, %24 : vector<128x128xf32>
      %26 = tpu.iota {dimensions = array<i32: 1>} : vector<16x128xi32>
      %27 = vector.broadcast %9 : i32 to vector<16x128xi32>
      %28 = arith.addi %27, %26 : vector<16x128xi32>
      %c0_14 = arith.constant 0 : index
      %c0_15 = arith.constant 0 : index
      %29 = vector.load %arg7[%c0_14, %c0_15] : memref<16x1xi32, #tpu.memory_space<vmem>>, vector<16x1xi32>
      %30 = vector.broadcast %29 : vector<16x1xi32> to vector<16x128xi32>
      %31 = arith.cmpi sge, %28, %30 : vector<16x128xi32>
      %c0_16 = arith.constant 0 : index
      %c0_17 = arith.constant 0 : index
      %32 = vector.load %arg8[%c0_16, %c0_17] : memref<16x1xi32, #tpu.memory_space<vmem>>, vector<16x1xi32>
      %33 = vector.broadcast %32 : vector<16x1xi32> to vector<16x128xi32>
      %34 = arith.cmpi slt, %28, %33 : vector<16x128xi32>
      %35 = arith.andi %31, %34 : vector<16x128xi1>
      %36 = arith.extui %35 : vector<16x128xi1> to vector<16x128xi32>
      %37 = arith.sitofp %36 : vector<16x128xi32> to vector<16x128xf32>
      %c0_18 = arith.constant 0 : index
      %c0_19 = arith.constant 0 : index
      %38 = vector.load %arg13[%c0_18, %c0_19] : memref<16x128xf32, #tpu.memory_space<vmem>>, vector<16x128xf32>
      %cst_20 = arith.constant dense<0.000000e+00> : vector<16x128xf32>
      %39 = tpu.matmul %37, %25, %cst_20 {dimension_numbers = #tpu.dot_dimension_numbers<[1], [0], [0], [1], [0, 0, 1, 1], [], []>} : vector<16x128xf32>, vector<128x128xf32>, vector<16x128xf32> -> vector<16x128xf32>
      %40 = arith.addf %38, %39 : vector<16x128xf32>
      %c0_21 = arith.constant 0 : index
      %c0_22 = arith.constant 0 : index
      %41 = vector.load %arg13[%c0_21, %c0_22] : memref<16x128xf32, #tpu.memory_space<vmem>>, vector<16x128xf32>
      tpu.vector_store %arg13[%c0_21, %c0_22], %40 {strides = array<i32>} : memref<16x128xf32, #tpu.memory_space<vmem>>, vector<16x128xf32>,
    } else {
    }
    %c0_i32_4 = arith.constant 0 : i32
    %16 = arith.cmpi eq, %arg1, %c0_i32_4 : i32
    %17 = arith.extui %16 : i1 to i32
    %c0_i32_5 = arith.constant 0 : i32
    %18 = arith.cmpi ne, %17, %c0_i32_5 : i32
    scf.if %18 {
      %c0 = arith.constant 0 : index
      %c0_6 = arith.constant 0 : index
      %19 = vector.load %arg13[%c0, %c0_6] : memref<16x128xf32, #tpu.memory_space<vmem>>, vector<16x128xf32>
      %c0_7 = arith.constant 0 : index
      %c0_8 = arith.constant 0 : index
      %20 = vector.load %arg9[%c0_7, %c0_8] : memref<16x128xf32, #tpu.memory_space<vmem>>, vector<16x128xf32>
      %c0_9 = arith.constant 0 : index
      %c0_10 = arith.constant 0 : index
      %21 = vector.load %arg10[%c0_9, %c0_10] : memref<128x128xf32, #tpu.memory_space<vmem>>, vector<128x128xf32>
      %cst = arith.constant dense<0.000000e+00> : vector<16x128xf32>
      %22 = tpu.matmul %20, %21, %cst {dimension_numbers = #tpu.dot_dimension_numbers<[1], [0], [0], [1], [0, 0, 1, 1], [], []>} : vector<16x128xf32>, vector<128x128xf32>, vector<16x128xf32> -> vector<16x128xf32>
      %c0_11 = arith.constant 0 : index
      %c0_12 = arith.constant 0 : index
      %23 = vector.load %arg11[%c0_11, %c0_12] : memref<128x128xf32, #tpu.memory_space<vmem>>, vector<128x128xf32>
      %cst_13 = arith.constant dense<0.000000e+00> : vector<16x128xf32>
      %24 = tpu.matmul %19, %23, %cst_13 {dimension_numbers = #tpu.dot_dimension_numbers<[1], [0], [0], [1], [0, 0, 1, 1], [], []>} : vector<16x128xf32>, vector<128x128xf32>, vector<16x128xf32> -> vector<16x128xf32>
      %25 = arith.addf %22, %24 : vector<16x128xf32>
      %c0_14 = arith.constant 0 : index
      %c0_15 = arith.constant 0 : index
      %26 = vector.load %arg12[%c0_14, %c0_15] : memref<16x128xf32, #tpu.memory_space<vmem>>, vector<16x128xf32>
      tpu.vector_store %arg12[%c0_14, %c0_15], %25 {strides = array<i32>} : memref<16x128xf32, #tpu.memory_space<vmem>>, vector<16x128xf32>,
    } else {
    }
    return
  }
  func.func @transform_0(%arg0: i32, %arg1: i32, %arg2: memref<17xi32, #tpu.memory_space<smem>>) -> (i32, i32) {
    %c0_i32 = arith.constant 0 : i32
    %c0_i32_0 = arith.constant 0 : i32
    return %arg1, %c0_i32 : i32, i32
  }
  func.func @transform_1(%arg0: i32, %arg1: i32, %arg2: memref<17xi32, #tpu.memory_space<smem>>) -> (i32, i32) {
    %c0_i32 = arith.constant 0 : i32
    %c0_i32_0 = arith.constant 0 : i32
    return %arg1, %c0_i32 : i32, i32
  }
  func.func @transform_2(%arg0: i32, %arg1: i32, %arg2: memref<17xi32, #tpu.memory_space<smem>>) -> (i32, i32) {
    %c0_i32 = arith.constant 0 : i32
    %c0_i32_0 = arith.constant 0 : i32
    %c0_i32_1 = arith.constant 0 : i32
    return %c0_i32, %c0_i32_0 : i32, i32
  }
  func.func @transform_3(%arg0: i32, %arg1: i32, %arg2: memref<17xi32, #tpu.memory_space<smem>>) -> (i32, i32) {
    %c0_i32 = arith.constant 0 : i32
    %c0_i32_0 = arith.constant 0 : i32
    %c0_i32_1 = arith.constant 0 : i32
    return %c0_i32, %c0_i32_0 : i32, i32
  }
  func.func @transform_4(%arg0: i32, %arg1: i32, %arg2: memref<17xi32, #tpu.memory_space<smem>>) -> (i32, i32) {
    %c0_i32 = arith.constant 0 : i32
    %c0_i32_0 = arith.constant 0 : i32
    return %arg0, %c0_i32 : i32, i32
  }
  func.func @transform_5(%arg0: i32, %arg1: i32, %arg2: memref<17xi32, #tpu.memory_space<smem>>) -> (i32, i32) {
    %c0_i32 = arith.constant 0 : i32
    %c0_i32_0 = arith.constant 0 : i32
    return %arg0, %c0_i32 : i32, i32
  }
  func.func @transform_6(%arg0: i32, %arg1: i32, %arg2: memref<17xi32, #tpu.memory_space<smem>>) -> (i32, i32) {
    %c0_i32 = arith.constant 0 : i32
    %c0_i32_0 = arith.constant 0 : i32
    return %arg0, %c0_i32 : i32, i32
  }
  func.func @transform_7(%arg0: i32, %arg1: i32, %arg2: memref<17xi32, #tpu.memory_space<smem>>) -> (i32, i32) {
    %c0_i32 = arith.constant 0 : i32
    %c0_i32_0 = arith.constant 0 : i32
    %c0_i32_1 = arith.constant 0 : i32
    return %c0_i32, %c0_i32_0 : i32, i32
  }
  func.func @transform_8(%arg0: i32, %arg1: i32, %arg2: memref<17xi32, #tpu.memory_space<smem>>) -> (i32, i32) {
    %c0_i32 = arith.constant 0 : i32
    %c0_i32_0 = arith.constant 0 : i32
    %c0_i32_1 = arith.constant 0 : i32
    return %c0_i32, %c0_i32_0 : i32, i32
  }
  func.func @transform_9(%arg0: i32, %arg1: i32, %arg2: memref<17xi32, #tpu.memory_space<smem>>) -> (i32, i32) {
    %c0_i32 = arith.constant 0 : i32
    %c0_i32_0 = arith.constant 0 : i32
    return %arg0, %c0_i32 : i32, i32
  }
}

</mosaic_0001>

<bundles_post_ra>
// kernel: tpu_custom_call.1
= control target key start
LH: loop header
LB: loop body
LE: loop exit
PB: predicated region body
PF: predicated region fallthrough
CT: control target
= control target key end

     0   :  { %s1752_s0 = inlined_call_operand.vmem [shape: s32[17], index: 0, kind: input, shape index: {}]   ;;  %s1753_s1 = inlined_call_operand.hbm [shape: f32[128,128], index: 1, kind: input, shape index: {}]   ;;  %s1754_s2 = inlined_call_operand.hbm [shape: f32[128,128], index: 2, kind: input, shape index: {}]   ;;  %s1755_s3 = inlined_call_operand.hbm [shape: f32[128,128], index: 3, kind: input, shape index: {}]   ;;  %s1756_s4 = inlined_call_operand.hbm [shape: f32[128,128], index: 4, kind: input, shape index: {}]   ;;  %s1757_s5 = inlined_call_operand.vmem [shape: s32[16,1], index: 5, kind: input, shape index: {}]   ;;  %s1758_s6 = inlined_call_operand.vmem [shape: s32[16,1], index: 6, kind: input, shape index: {}]   ;;  %s1759_s7 = inlined_call_operand.vmem [shape: f32[16,128], index: 7, kind: input, shape index: {}]   ;;  %s1760_s8 = inlined_call_operand.hbm [shape: f32[128,128], index: 8, kind: input, shape index: {}]   ;;  %s1761_s9 = inlined_call_operand.hbm [shape: f32[128,128], index: 9, kind: input, shape index: {}]   ;;  %s1762_s10 = inlined_call_operand.hbm [shape: f32[16,128], index: 10, kind: output, shape index: {}]  }
   0x1   :  { %s15_s15 = sshll.u32 %s1752_s0, 4  ;;  %s16_s15 = int_to_ptr.vmem [resolvable:$true] %s15_s15 }
   0x2   :  { %s1351_s16 = scalar_lea.vmem %s16_s15, 16  ;;  %p1356_p1 = scmp.lt.s32.totalorder %s16_s15, %s16_s15 }
   0x3   :  { %p1352_p0 = scmp.ne.s32.totalorder %s16_s15, %s1351_s16  ;;  %p1357_p2 = scmp.lt.s32.totalorder %s1351_s16, %s1351_s16 }
   0x5   :  { %p1358_p3 = por %p1357_p2, %p1356_p1 }
   0x7   :  { %p1359_p4 = pnand %p1358_p3, %p1352_p0 }
   0x9   :  { %1362 = shalt.err (!%p1359_p4)  }
   0xa   :  { %s1529_s17 = smov [#allocation4]  }
   0xb   :  { %18 = dma.vmem_to_smem %s16_s15, 16, %s1529_s17, [#allocation3] }
   0xc   :  { %1517 = dma.done.wait [#allocation3], 16 }
   0xd   :  { %1518 = vsyncadd [#allocation3], 4294967280 }
   0xe   :  { %20 = sfence }
   0xf   :  { %21 = vsyncpa [#allocation6], 0 }
  0x10   :  { %22 = vsyncpa [#allocation9], 0 }
  0x11   :  { %23 = vsyncpa [#allocation12], 0 }
  0x12   :  { %24 = vsyncpa [#allocation15], 0 }
  0x13   :  { %25 = vsyncpa [#allocation7], 0  ;;  %s1530_s18 = smov [#allocation8]   ;;  %s1531_s19 = smov [#allocation11]  }
  0x14   :  { %s43_s0 = sshll.u32 %s1530_s18, 4  ;;  %s67_s20 = sshll.u32 %s1531_s19, 4  ;;  %s44_s0 = int_to_ptr.vmem [resolvable:$true] %s43_s0  ;;  %s1600_s20 = int_to_ptr.vmem [resolvable:$true] %s67_s20 }
  0x15   :  { %s1363_s23 = scalar_lea.hbm %s1754_s2, 2048 }
  0x16   :  { %p1364_p5 = scmp.ne.s32.totalorder %s1754_s2, %s1363_s23  ;;  %p1367_p6 = scmp.lt.u32.totalorder %s1363_s23, %s1754_s2 }
  0x18   :  { %p1369_p7 = pnand %p1367_p6, %p1364_p5 }
  0x1a   :  { %1372 = shalt.err (!%p1369_p7)
}
  0x1b   :  { %s1373_s28 = scalar_lea.vmem %s44_s0, 2048  ;;  %p1378_p9 = scmp.lt.s32.totalorder %s44_s0, %s44_s0 }
  0x1c   :  { %p1374_p8 = scmp.ne.s32.totalorder %s44_s0, %s1373_s28  ;;  %p1379_p10 = scmp.lt.s32.totalorder %s1373_s28, %s1373_s28 }
  0x1e   :  { %p1380_p11 = por %p1379_p10, %p1378_p9 }
  0x20   :  { %p1381_p12 = pnand %p1380_p11, %p1374_p8 }
  0x22   :  { %1384 = shalt.err (!%p1381_p12)
}
  0x23   :  { %s1532_s29 = smov 128   ;;  %s1533_s30 = smov 8  }
  0x24   :  { %49 = dma.hbm_to_vmem [thread:$0]  %s1754_s2, 2048, %s44_s0, [#allocation9], %s1532_s29, %s1532_s29, %s1533_s30  }
  0x25   :  { %s1385_s15 = scalar_lea.hbm %s1756_s4, 2048 }
  0x26   :  { %p1386_p13 = scmp.ne.s32.totalorder %s1756_s4, %s1385_s15  ;;  %p1389_p0 = scmp.lt.u32.totalorder %s1385_s15, %s1756_s4 }
  0x28   :  { %p1391_p1 = pnand %p1389_p0, %p1386_p13 }
  0x2a   :  { %1394 = shalt.err (!%p1391_p1)
}
  0x2b   :  { %s1395_s21 = scalar_lea.vmem %s1600_s20, 2048  ;;  %p1400_p3 = scmp.lt.s32.totalorder %s1600_s20, %s1600_s20 }
  0x2c   :  { %p1396_p2 = scmp.ne.s32.totalorder %s1600_s20, %s1395_s21  ;;  %p1401_p4 = scmp.lt.s32.totalorder %s1395_s21, %s1395_s21 }
  0x2e   :  { %p1402_p5 = por %p1401_p4, %p1400_p3 }
  0x30   :  { %p1403_p6 = pnand %p1402_p5, %p1396_p2 }
  0x32   :  { %1406 = shalt.err (!%p1403_p6)
}
  0x33   :  { %73 = dma.hbm_to_vmem [thread:$0]  %s1756_s4, 2048, %s1600_s20, [#allocation12], %s1532_s29, %s1532_s29, %s1533_s30  }
  0x34   :  { %s1534_s22 = smov [#allocation5]   ;;  %s1535_s24 = smov [#allocation10]  }
  0x35   :  { %s31_s23 = sshll.u32 %s1534_s22, 4  ;;  %s55_s25 = sshll.u32 %s1535_s24, 4  ;;  %s32_s23 = int_to_ptr.vmem [resolvable:$true] %s31_s23  ;;  %s1637_s25 = int_to_ptr.vmem [resolvable:$true] %s55_s25 }
  0x36   :  { %s1407_s28 = scalar_lea.hbm %s1753_s1, 2048 }
  0x37   :  { %p1408_p7 = scmp.ne.s32.totalorder %s1753_s1, %s1407_s28  ;;  %p1411_p8 = scmp.lt.u32.totalorder %s1407_s28, %s1753_s1 }
  0x39   :  { %p1413_p9 = pnand %p1411_p8, %p1408_p7 }
  0x3b   :  { %1416 = shalt.err (!%p1413_p9)
}
  0x3c   :  { %s1417_s4 = scalar_lea.vmem %s32_s23, 2048  ;;  %p1422_p11 = scmp.lt.s32.totalorder %s32_s23, %s32_s23 }
  0x3d   :  { %p1418_p10 = scmp.ne.s32.totalorder %s32_s23, %s1417_s4  ;;  %p1423_p12 = scmp.lt.s32.totalorder %s1417_s4, %s1417_s4 }
  0x3f   :  { %p1424_p13 = por %p1423_p12, %p1422_p11 }
  0x41   :  { %p1425_p0 = pnand %p1424_p13, %p1418_p10 }
  0x43   :  { %1428 = shalt.err (!%p1425_p0)
}
  0x44   :  { %37 = dma.hbm_to_vmem [thread:$0]  %s1753_s1, 2048, %s32_s23, [#allocation6], %s1532_s29, %s1532_s29, %s1533_s30  }
  0x45   :  { %s1429_s18 = scalar_lea.hbm %s1755_s3, 2048 }
  0x46   :  { %p1430_p1 = scmp.ne.s32.totalorder %s1755_s3, %s1429_s18  ;;  %p1433_p2 = scmp.lt.u32.totalorder %s1429_s18, %s1755_s3 }
  0x48   :  { %p1435_p3 = pnand %p1433_p2, %p1430_p1 }
  0x4a   :  { %1438 = shalt.err (!%p1435_p3)
}
  0x4b   :  { %s1439_s22 = scalar_lea.vmem %s1637_s25, 2048  ;;  %p1444_p5 = scmp.lt.s32.totalorder %s1637_s25, %s1637_s25 }
  0x4c   :  { %p1440_p4 = scmp.ne.s32.totalorder %s1637_s25, %s1439_s22  ;;  %p1445_p6 = scmp.lt.s32.totalorder %s1439_s22, %s1439_s22 }
  0x4e   :  { %p1446_p7 = por %p1445_p6, %p1444_p5 }
  0x50   :  { %p1447_p8 = pnand %p1446_p7, %p1440_p4 }
  0x52   :  { %1450 = shalt.err (!%p1447_p8)
}
  0x53   :  { %61 = dma.hbm_to_vmem [thread:$0]  %s1755_s3, 2048, %s1637_s25, [#allocation9], %s1532_s29, %s1532_s29, %s1533_s30  }
  0x54   :  { %s1536_s24 = smov [#allocation13]   ;;  %s1537_s27 = smov [#allocation14]  }
  0x55   :  { %s85_s26 = sshll.u32 %s1536_s24, 4  ;;  %s97_s28 = sshll.u32 %s1537_s27, 4  ;;  %s86_s26 = int_to_ptr.vmem [resolvable:$true] %s85_s26  ;;  %s1674_s28 = int_to_ptr.vmem [resolvable:$true] %s97_s28 }
  0x56   :  { %s1451_s13 = scalar_lea.hbm %s1760_s8, 2048 }
  0x57   :  { %p1452_p9 = scmp.ne.s32.totalorder %s1760_s8, %s1451_s13  ;;  %p1455_p10 = scmp.lt.u32.totalorder %s1451_s13, %s1760_s8 }
  0x59   :  { %p1457_p11 = pnand %p1455_p10, %p1452_p9 }
  0x5b   :  { %1460 = shalt.err (!%p1457_p11)
}
  0x5c   :  { %s1461_s3 = scalar_lea.vmem %s86_s26, 2048  ;;  %p1466_p13 = scmp.lt.s32.totalorder %s86_s26, %s86_s26 }
  0x5d   :  { %p1462_p12 = scmp.ne.s32.totalorder %s86_s26, %s1461_s3  ;;  %p1467_p0 = scmp.lt.s32.totalorder %s1461_s3, %s1461_s3 }
  0x5f   :  { %p1468_p1 = por %p1467_p0, %p1466_p13 }
  0x61   :  { %p1469_p2 = pnand %p1468_p1, %p1462_p12 }
  0x63   :  { %1472 = shalt.err (!%p1469_p2)
}
  0x64   :  { %91 = dma.hbm_to_vmem [thread:$0]  %s1760_s8, 2048, %s86_s26, [#allocation12], %s1532_s29, %s1532_s29, %s1533_s30  }
  0x65   :  { %s1473_s19 = scalar_lea.hbm %s1761_s9, 2048 }
  0x66   :  { %p1474_p3 = scmp.ne.s32.totalorder %s1761_s9, %s1473_s19  ;;  %p1477_p4 = scmp.lt.u32.totalorder %s1473_s19, %s1761_s9 }
  0x68   :  { %p1479_p5 = pnand %p1477_p4, %p1474_p3 }
  0x6a   :  { %1482 = shalt.err (!%p1479_p5)
}
  0x6b   :  { %s1483_s1 = scalar_lea.vmem %s1674_s28, 2048  ;;  %p1488_p7 = scmp.lt.s32.totalorder %s1674_s28, %s1674_s28 }
  0x6c   :  { %p1484_p6 = scmp.ne.s32.totalorder %s1674_s28, %s1483_s1  ;;  %p1489_p8 = scmp.lt.s32.totalorder %s1483_s1, %s1483_s1 }
  0x6e   :  { %p1490_p9 = por %p1489_p8, %p1488_p7 }
  0x70   :  { %p1491_p10 = pnand %p1490_p9, %p1484_p6 }
  0x72   :  { %1494 = shalt.err (!%p1491_p10)
}
  0x73   :  { %103 = dma.hbm_to_vmem [thread:$0]  %s1761_s9, 2048, %s1674_s28, [#allocation15], %s1532_s29, %s1532_s29, %s1533_s30  }
  0x74   :  { %1519 = dma.done.wait [#allocation6], 2048  }
  0x75   :  { %1520 = vsyncadd [#allocation6], 4294965248 }
  0x76   :  { %1521 = dma.done.wait [#allocation9], 4096  }
  0x77   :  { %1522 = vsyncadd [#allocation9], 4294963200 }
  0x78   :  { %1523 = dma.done.wait [#allocation12], 4096  }
  0x79   :  { %1524 = vsyncadd [#allocation12], 4294963200 }
  0x7a   :  { %1525 = dma.done.wait [#allocation15], 2048  }
  0x7b   :  { %1526 = vsyncadd [#allocation15], 4294965248  ;;  %s129_s24 = sld [smem:[#allocation4]]  ;;  %v1538_v0 = vmov 0.0  }
  0x7c   :  { %s832_s26 = sld [smem:[#allocation4 + $0x10]]  ;;  %126 = vst [vmem:[#allocation2] sm:$0xff] %v1538_v0  ;;  %127 = vst [vmem:[#allocation2 + $0x8] sm:$0xff] %v1538_v0 }
  0x81   :  { %p834_p12 = scmp.lt.s32.totalorder %s129_s24, 128 }
  0x82   :  { %p833_p11 = scmp.gt.s32.totalorder %s832_s26, 0 }
  0x84   :  { %p136_p13 = pnand %p834_p12, %p833_p11 }
  0x85   :  { %v156_v1 = vld [vmem:[#allocation10] sm:$0xff] (!%p136_p13)  ;;  %v157_v2 = vld [vmem:[#allocation10 + $0x8] sm:$0xff] (!%p136_p13)  ;;  %v158_v6 = vld [vmem:[#allocation10 + $0x10] sm:$0xff] (!%p136_p13)  ;;  %v1539_v8 = vmov (!%p136_p13), 0  }
  0x86   :  { %139 = sbr.rel (%p136_p13) target bundleno = 634 (0x27a), region = 69  ;;  %v333_v3 = vld [vmem:[#allocation11] sm:$0xff] (!%p136_p13)  ;;  %v1174_v4 = vpack.c.bf16 (!%p136_p13), %v157_v2, %v156_v1  ;;  %v334_v5 = vld [vmem:[#allocation11 + $0x8] sm:$0xff] (!%p136_p13)  ;;  %v159_v7 = vld [vmem:[#allocation10 + $0x18] sm:$0xff] (!%p136_p13)  ;;  %1349 = vset.pattern.permute.xlu0 (!%p136_p13), %v1539_v8  ;;  %1350 = vset.pattern.permute.xlu1 (!%p136_p13), %v1539_v8 }
  0x87   :  { %v1206_v9 = vpack.c.bf16 (!%p136_p13), %v334_v5, %v333_v3  ;;  %v1178_v10 = vpack.c.bf16 (!%p136_p13), %v159_v7, %v158_v6  ;;  %v335_v11 = vld [vmem:[#allocation11 + $0x10] sm:$0xff] (!%p136_p13)  ;;  %v336_v12 = vld [vmem:[#allocation11 + $0x18] sm:$0xff] (!%p136_p13)  ;;  %v160_v13 = vld [vmem:[#allocation10 + $0x20] sm:$0xff] (!%p136_p13) }
  0x88   :  { %1175 = vmatprep.subr.bf16.mxu0 (!%p136_p13), %v1174_v4  ;;  %v1210_v14 = vpack.c.bf16 (!%p136_p13), %v336_v12, %v335_v11  ;;  %v161_v15 = vld [vmem:[#allocation10 + $0x28] sm:$0xff] (!%p136_p13)  ;;  %v337_v16 = vld [vmem:[#allocation11 + $0x20] sm:$0xff] (!%p136_p13)  ;;  %v162_v20 = vld [vmem:[#allocation10 + $0x30] sm:$0xff] (!%p136_p13) }
  0x89   :  { %v338_v17 = vld [vmem:[#allocation11 + $0x28] sm:$0xff] (!%p136_p13)  ;;  %1207 = vmatprep.subr.bf16.mxu1 (!%p136_p13), %v1206_v9  ;;  %1177 = vmatpush3.bf16.msra.mxu0 (!%p136_p13), %v1174_v4  ;;  %v1182_v18 = vpack.c.bf16 (!%p136_p13), %v161_v15, %v160_v13  ;;  %v163_v21 = vld [vmem:[#allocation10 + $0x38] sm:$0xff] (!%p136_p13)  ;;  %v339_v22 = vld [vmem:[#allocation11 + $0x30] sm:$0xff] (!%p136_p13) }
  0x8a   :  { %1209 = vmatpush3.bf16.msra.mxu1 (!%p136_p13), %v1206_v9  ;;  %1179 = vmatprep.subr.bf16.mxu0 (!%p136_p13), %v1178_v10  ;;  %v1214_v19 = vpack.c.bf16 (!%p136_p13), %v338_v17, %v337_v16  ;;  %v340_v23 = vld [vmem:[#allocation11 + $0x38] sm:$0xff] (!%p136_p13)  ;;  %v1186_v24 = vpack.c.bf16 (!%p136_p13), %v163_v21, %v162_v20  ;;  %v164_v26 = vld [vmem:[#allocation10 + $0x40] sm:$0xff] (!%p136_p13)  ;;  %v165_v27 = vld [vmem:[#allocation10 + $0x48] sm:$0xff] (!%p136_p13) }
  0x8b   :  { %1211 = vmatprep.subr.bf16.mxu1 (!%p136_p13), %v1210_v14  ;;  %v1218_v25 = vpack.c.bf16 (!%p136_p13), %v340_v23, %v339_v22  ;;  %v140_v28 = vld [vmem:[#allocation5] sm:$0xff] (!%p136_p13)  ;;  %v342_v30 = vld [vmem:[#allocation11 + $0x48] sm:$0xff] (!%p136_p13)  ;;  %v1190_v32 = vpack.c.bf16 (!%p136_p13), %v165_v27, %v164_v26  ;;  %v166_v34 = vld [vmem:[#allocation10 + $0x50] sm:$0xff] (!%p136_p13)  ;;  %v510_v22 = vlaneseq (!%p136_p13)  ;;  %v1540_v26 = vmov (!%p136_p13), 1.0  }
  0x8c   :  { %v341_v29 = vld [vmem:[#allocation11 + $0x40] sm:$0xff] (!%p136_p13)  ;;  %989 = vmatprep.mubr.f32.mxu0 (!%p136_p13), %v140_v28  ;;  %v167_v35 = vld [vmem:[#allocation10 + $0x58] sm:$0xff] (!%p136_p13)  ;;  %v343_v36 = vld [vmem:[#allocation11 + $0x50] sm:$0xff] (!%p136_p13) }
  0x8d   :  { %1181 = vmatpush3.bf16.msra.mxu0 %v1178_v10  ;;  %v317_v31 = vld [vmem:[#allocation8] sm:$0xff]  ;;  %v1222_v33 = vpack.c.bf16 %v342_v30, %v341_v29  ;;  %v344_v37 = vld [vmem:[#allocation11 + $0x58] sm:$0xff]  ;;  %v1194_v38 = vpack.c.bf16 %v167_v35, %v166_v34  ;;  %v169_v41 = vld [vmem:[#allocation10 + $0x68] sm:$0xff]  ;;  %v1723_v23 = vand.u32 127, %v510_v22 }
  0x8e   :  { %1213 = vmatpush3.bf16.msra.mxu1 %v1210_v14  ;;  %1183 = vmatprep.subr.bf16.mxu0 %v1182_v18  ;;  %v1226_v39 = vpack.c.bf16 %v344_v37, %v343_v36  ;;  %v168_v40 = vld [vmem:[#allocation10 + $0x60] sm:$0xff]  ;;  %v346_v43 = vld [vmem:[#allocation11 + $0x68] sm:$0xff]  ;;  %v514_v45 = vld [vmem:[%s1757_s5] sm:$0xff] }
  0x8f   :  { %1215 = vmatprep.subr.bf16.mxu1 %v1214_v19  ;;  %1045 = vmatprep.mubr.f32.mxu1 %v317_v31  ;;  %v345_v42 = vld [vmem:[#allocation11 + $0x60] sm:$0xff]  ;;  %v1198_v44 = vpack.c.bf16 %v169_v41, %v168_v40  ;;  %v515_v46 = vld [vmem:[%s1757_s5 + $0x8] sm:$0xff]  ;;  %v170_v48 = vld [vmem:[#allocation10 + $0x70] sm:$0xff] }
  0x90   :  { %v1230_v47 = vpack.c.bf16 %v346_v43, %v345_v42  ;;  %v171_v49 = vld [vmem:[#allocation10 + $0x78] sm:$0xff]  ;;  %517 = vperm.xlu0 %1349, %v514_v45   ;;  %v347_v50 = vld [vmem:[#allocation11 + $0x70] sm:$0xff]  ;;  %520 = vperm.xlu1 %1350, %v515_v46   ;;  %v141_v56 = vld [vmem:[#allocation5 + $0x8] sm:$0xff] }
  0x91   :  { %1185 = vmatpush3.bf16.msra.mxu0 %v1182_v18  ;;  %v348_v51 = vld [vmem:[#allocation11 + $0x78] sm:$0xff]  ;;  %v524_v52 = vld [vmem:[%s1758_s6] sm:$0xff]  ;;  %v1202_v54 = vpack.c.bf16 %v171_v49, %v170_v48  ;;  %v318_v57 = vld [vmem:[#allocation8 + $0x8] sm:$0xff] }
  0x92   :  { %1217 = vmatpush3.bf16.msra.mxu1 %v1214_v19  ;;  %1187 = vmatprep.subr.bf16.mxu0 %v1186_v24  ;;  %v525_v53 = vld [vmem:[%s1758_s6 + $0x8] sm:$0xff]  ;;  %v1234_v55 = vpack.c.bf16 %v348_v51, %v347_v50  ;;  %v142_v58 = vld [vmem:[#allocation5 + $0x10] sm:$0xff]  ;;  %v144_v62 = vld [vmem:[#allocation5 + $0x20] sm:$0xff] }
  0x93   :  { %1219 = vmatprep.subr.bf16.mxu1 %v1218_v25  ;;  %v319_v59 = vld [vmem:[#allocation8 + $0x10] sm:$0xff]  ;;  %v143_v60 = vld [vmem:[#allocation5 + $0x18] sm:$0xff]  ;;  %v321_v63 = vld [vmem:[#allocation8 + $0x20] sm:$0xff] }
  0x94   :  { %527 = vperm.xlu0 %1349, %v524_v52   ;;  %530 = vperm.xlu1 %1350, %v525_v53   ;;  %v320_v61 = vld [vmem:[#allocation8 + $0x18] sm:$0xff]  ;;  %v145_v0 = vld [vmem:[#allocation5 + $0x28] sm:$0xff]  ;;  %v146_v2 = vld [vmem:[#allocation5 + $0x30] sm:$0xff] }
  0x95   :  { %1189 = vmatpush3.bf16.msra.mxu0 %v1186_v24  ;;  %v322_v1 = vld [vmem:[#allocation8 + $0x28] sm:$0xff]  ;;  %v323_v3 = vld [vmem:[#allocation8 + $0x30] sm:$0xff]  ;;  %v147_v4 = vld [vmem:[#allocation5 + $0x38] sm:$0xff] }
  0x96   :  { %1221 = vmatpush3.bf16.msra.mxu1 %v1218_v25  ;;  %1191 = vmatprep.subr.bf16.mxu0 %v1190_v32  ;;  %v324_v5 = vld [vmem:[#allocation8 + $0x38] sm:$0xff]  ;;  %v148_v6 = vld [vmem:[#allocation5 + $0x40] sm:$0xff]  ;;  %v149_v8 = vld [vmem:[#allocation5 + $0x48] sm:$0xff] }
  0x97   :  { %1223 = vmatprep.subr.bf16.mxu1 %v1222_v33  ;;  %v325_v7 = vld [vmem:[#allocation8 + $0x40] sm:$0xff]  ;;  %v326_v9 = vld [vmem:[#allocation8 + $0x48] sm:$0xff]  ;;  %v150_v10 = vld [vmem:[#allocation5 + $0x50] sm:$0xff] }
  0x98   :  { %v327_v11 = vld [vmem:[#allocation8 + $0x50] sm:$0xff]  ;;  %v151_v12 = vld [vmem:[#allocation5 + $0x58] sm:$0xff]  ;;  %v152_v14 = vld [vmem:[#allocation5 + $0x60] sm:$0xff] }
  0x99   :  { %1193 = vmatpush3.bf16.msra.mxu0 %v1190_v32  ;;  %v328_v13 = vld [vmem:[#allocation8 + $0x58] sm:$0xff]  ;;  %v329_v15 = vld [vmem:[#allocation8 + $0x60] sm:$0xff]  ;;  %v153_v16 = vld [vmem:[#allocation5 + $0x68] sm:$0xff] }
  0x9a   :  { %1225 = vmatpush3.bf16.msra.mxu1 %v1222_v33  ;;  %1195 = vmatprep.subr.bf16.mxu0 %v1194_v38  ;;  %v330_v17 = vld [vmem:[#allocation8 + $0x68] sm:$0xff]  ;;  %v154_v18 = vld [vmem:[#allocation5 + $0x70] sm:$0xff]  ;;  %v155_v20 = vld [vmem:[#allocation5 + $0x78] sm:$0xff] }
  0x9b   :  { %1227 = vmatprep.subr.bf16.mxu1 %v1226_v39  ;;  %v331_v19 = vld [vmem:[#allocation8 + $0x70] sm:$0xff]  ;;  %v332_v21 = vld [vmem:[#allocation8 + $0x78] sm:$0xff] }
  0x9c   :  { %v540_v22 = vld [vmem:[#allocation2] sm:$0xff] }
  0x9d   :  { %1197 = vmatpush3.bf16.msra.mxu0 %v1194_v38 }
  0x9e   :  { %1229 = vmatpush3.bf16.msra.mxu1 %v1226_v39  ;;  %1199 = vmatprep.subr.bf16.mxu0 %v1198_v44 }
  0x9f   :  { %1231 = vmatprep.subr.bf16.mxu1 %v1230_v47 }
  0xa1   :  { %1201 = vmatpush3.bf16.msra.mxu0 %v1198_v44 }
  0xa2   :  { %1233 = vmatpush3.bf16.msra.mxu1 %v1230_v47  ;;  %1203 = vmatprep.subr.bf16.mxu0 %v1202_v54 }
  0xa3   :  { %1235 = vmatprep.subr.bf16.mxu1 %v1234_v55 }
  0xa5   :  { %1205 = vmatpush3.bf16.msra.mxu0 %v1202_v54 }
  0xa6   :  { %1237 = vmatpush3.bf16.msra.mxu1 %v1234_v55 }
  0xa8   :  { %990 = vmatmul.mubr.f32.vlgmr.msra.gmra.mrb[0].mxu0 %v141_v56 }
  0xa9   :  { %1046 = vmatmul.mubr.f32.vlgmr.msra.gmra.mrb[0].mxu1 %v318_v57  ;;  %992 = vmatprep.mubr.f32.mxu0 %v142_v58 }
  0xaa   :  { %1048 = vmatprep.mubr.f32.mxu1 %v319_v59 }
  0xac   :  { %993 = vmatmul.mubr.f32.gmra.mrb[2].mxu0 %v143_v60 }
  0xad   :  { %1049 = vmatmul.mubr.f32.gmra.mrb[2].mxu1 %v320_v61  ;;  %995 = vmatprep.mubr.f32.mxu0 %v144_v62 }
  0xae   :  { %1051 = vmatprep.mubr.f32.mxu1 %v321_v63 }
  0xb0   :  { %996 = vmatmul.mubr.f32.gmra.mrb[4].mxu0 %v145_v0 }
  0xb1   :  { %1052 = vmatmul.mubr.f32.gmra.mrb[4].mxu1 %v322_v1  ;;  %998 = vmatprep.mubr.f32.mxu0 %v146_v2 }
  0xb2   :  { %1054 = vmatprep.mubr.f32.mxu1 %v323_v3 }
  0xb4   :  { %999 = vmatmul.mubr.f32.gmra.mrb[6].mxu0 %v147_v4 }
  0xb5   :  { %1055 = vmatmul.mubr.f32.gmra.mrb[6].mxu1 %v324_v5  ;;  %1001 = vmatprep.mubr.f32.mxu0 %v148_v6 }
  0xb6   :  { %1057 = vmatprep.mubr.f32.mxu1 %v325_v7 }
  0xb8   :  { %1002 = vmatmul.mubr.f32.gmra.mrb[8].mxu0 %v149_v8 }
  0xb9   :  { %1058 = vmatmul.mubr.f32.gmra.mrb[8].mxu1 %v326_v9  ;;  %1004 = vmatprep.mubr.f32.mxu0 %v150_v10 }
  0xba   :  { %1060 = vmatprep.mubr.f32.mxu1 %v327_v11 }
  0xbc   :  { %1005 = vmatmul.mubr.f32.gmra.mrb[10].mxu0 %v151_v12 }
  0xbd   :  { %1061 = vmatmul.mubr.f32.gmra.mrb[10].mxu1 %v328_v13  ;;  %1007 = vmatprep.mubr.f32.mxu0 %v152_v14 }
  0xbe   :  { %1063 = vmatprep.mubr.f32.mxu1 %v329_v15 }
  0xc0   :  { %1008 = vmatmul.mubr.f32.gmra.mrb[12].mxu0 %v153_v16 }
  0xc1   :  { %1064 = vmatmul.mubr.f32.gmra.mrb[12].mxu1 %v330_v17  ;;  %1010 = vmatprep.mubr.f32.mxu0 %v154_v18 }
  0xc2   :  { %1066 = vmatprep.mubr.f32.mxu1 %v331_v19 }
  0xc4   :  { %1011 = vmatmul.mubr.f32.gmra.mrb[14].mxu0 %v155_v20 }
  0xc5   :  { %1067 = vmatmul.mubr.f32.gmra.mrb[14].mxu1 %v332_v21  ;;  %v541_v21 = vld [vmem:[#allocation2 + $0x8] sm:$0xff] }
 0x10f   :  { %v518_v24 = vpop.permute.xlu0 %517  ;;  %v521_v10 = vpop.permute.xlu1 %520 }
 0x110   :  { %vm522_vm0 = vcmp.ge.s32.totalorder %v1723_v23, %v518_v24  ;;  %vm523_vm3 = vcmp.ge.s32.totalorder %v1723_v23, %v521_v10 }
 0x113   :  { %v528_v25 = vpop.permute.xlu0 %527  ;;  %v531_v19 = vpop.permute.xlu1 %530 }
 0x114   :  { %vm532_vm1 = vcmp.lt.s32.totalorder %v1723_v23, %v528_v25  ;;  %vm533_vm4 = vcmp.lt.s32.totalorder %v1723_v23, %v531_v19 }
 0x115   :  { %vm534_vm2 = vmand %vm522_vm0, %vm532_vm1 }
 0x116   :  { %1101 = vmatprep.mubr.msk.f32.mxu0 %vm534_vm2, %v1540_v26  ;;  %vm535_vm5 = vmand %vm523_vm3, %vm533_vm4 }
 0x17b   :  { %v991_v27 = vpop.f32.mrb[0].mxu0 }
 0x17c   :  { %v1047_v28 = vpop.f32.mrb[0].mxu1  ;;  %v238_v29 = vpop.f32.mrb[1].mxu0 }
 0x17d   :  { %v495_v30 = vmul.f32 %v1047_v28, %v991_v27  ;;  %v415_v31 = vpop.f32.mrb[1].mxu1 }
 0x17e   :  { %v494_v32 = vmul.f32 %v415_v31, %v238_v29 }
 0x17f   :  { %v994_v33 = vpop.f32.mrb[2].mxu0 }
 0x180   :  { %v1238_v34 = vpack.c.bf16 %v495_v30, %v494_v32  ;;  %v1050_v35 = vpop.f32.mrb[2].mxu1  ;;  %v248_v36 = vpop.f32.mrb[3].mxu0 }
 0x181   :  { %v497_v37 = vmul.f32 %v1050_v35, %v994_v33  ;;  %v425_v38 = vpop.f32.mrb[3].mxu1 }
 0x182   :  { %v496_v39 = vmul.f32 %v425_v38, %v248_v36  ;;  %1239 = vmatprep.subr.bf16.mxu0 %v1238_v34 }
 0x183   :  { %1241 = vmatpush3.bf16.msra.mxu0 %v1238_v34  ;;  %v997_v40 = vpop.f32.mrb[4].mxu0 }
 0x184   :  { %v1242_v41 = vpack.c.bf16 %v497_v37, %v496_v39  ;;  %v1053_v42 = vpop.f32.mrb[4].mxu1  ;;  %v258_v43 = vpop.f32.mrb[5].mxu0 }
 0x185   :  { %v499_v44 = vmul.f32 %v1053_v42, %v997_v40  ;;  %v435_v45 = vpop.f32.mrb[5].mxu1 }
 0x186   :  { %v498_v46 = vmul.f32 %v435_v45, %v258_v43  ;;  %1243 = vmatprep.subr.bf16.mxu0 %v1242_v41 }
 0x187   :  { %1245 = vmatpush3.bf16.msra.mxu0 %v1242_v41  ;;  %v1000_v47 = vpop.f32.mrb[6].mxu0 }
 0x188   :  { %v1246_v48 = vpack.c.bf16 %v499_v44, %v498_v46  ;;  %v1056_v49 = vpop.f32.mrb[6].mxu1  ;;  %v268_v50 = vpop.f32.mrb[7].mxu0 }
 0x189   :  { %v501_v51 = vmul.f32 %v1056_v49, %v1000_v47  ;;  %v445_v52 = vpop.f32.mrb[7].mxu1 }
 0x18a   :  { %v500_v53 = vmul.f32 %v445_v52, %v268_v50  ;;  %1247 = vmatprep.subr.bf16.mxu0 %v1246_v48 }
 0x18b   :  { %1249 = vmatpush3.bf16.msra.mxu0 %v1246_v48  ;;  %v1003_v54 = vpop.f32.mrb[8].mxu0 }
 0x18c   :  { %v1250_v55 = vpack.c.bf16 %v501_v51, %v500_v53  ;;  %v1059_v56 = vpop.f32.mrb[8].mxu1  ;;  %v278_v57 = vpop.f32.mrb[9].mxu0 }
 0x18d   :  { %v503_v58 = vmul.f32 %v1059_v56, %v1003_v54  ;;  %v455_v59 = vpop.f32.mrb[9].mxu1 }
 0x18e   :  { %v502_v60 = vmul.f32 %v455_v59, %v278_v57  ;;  %1251 = vmatprep.subr.bf16.mxu0 %v1250_v55 }
 0x18f   :  { %1253 = vmatpush3.bf16.msra.mxu0 %v1250_v55  ;;  %v1006_v61 = vpop.f32.mrb[10].mxu0 }
 0x190   :  { %v1254_v62 = vpack.c.bf16 %v503_v58, %v502_v60  ;;  %v1062_v63 = vpop.f32.mrb[10].mxu1  ;;  %v288_v0 = vpop.f32.mrb[11].mxu0 }
 0x191   :  { %v505_v1 = vmul.f32 %v1062_v63, %v1006_v61  ;;  %v465_v2 = vpop.f32.mrb[11].mxu1 }
 0x192   :  { %v504_v3 = vmul.f32 %v465_v2, %v288_v0  ;;  %1255 = vmatprep.subr.bf16.mxu0 %v1254_v62 }
 0x193   :  { %1257 = vmatpush3.bf16.msra.mxu0 %v1254_v62  ;;  %v1009_v4 = vpop.f32.mrb[12].mxu0 }
 0x194   :  { %v1258_v5 = vpack.c.bf16 %v505_v1, %v504_v3  ;;  %v1065_v6 = vpop.f32.mrb[12].mxu1  ;;  %v298_v7 = vpop.f32.mrb[13].mxu0 }
 0x195   :  { %v507_v8 = vmul.f32 %v1065_v6, %v1009_v4  ;;  %v475_v9 = vpop.f32.mrb[13].mxu1 }
 0x196   :  { %v506_v11 = vmul.f32 %v475_v9, %v298_v7  ;;  %1259 = vmatprep.subr.bf16.mxu0 %v1258_v5 }
 0x197   :  { %1261 = vmatpush3.bf16.msra.mxu0 %v1258_v5  ;;  %v1012_v12 = vpop.f32.mrb[14].mxu0 }
 0x198   :  { %v1262_v13 = vpack.c.bf16 %v507_v8, %v506_v11  ;;  %v1068_v14 = vpop.f32.mrb[14].mxu1  ;;  %v308_v15 = vpop.f32.mrb[15].mxu0 }
 0x199   :  { %v509_v16 = vmul.f32 %v1068_v14, %v1012_v12  ;;  %v485_v17 = vpop.f32.mrb[15].mxu1 }
 0x19a   :  { %v508_v18 = vmul.f32 %v485_v17, %v308_v15  ;;  %1263 = vmatprep.subr.bf16.mxu0 %v1262_v13 }
 0x19b   :  { %1265 = vmatpush3.bf16.msra.mxu0 %v1262_v13 }
 0x19c   :  { %v1266_v20 = vpack.c.bf16 %v509_v16, %v508_v18 }
 0x19e   :  { %1267 = vmatprep.subr.bf16.mxu0 %v1266_v20 }
 0x19f   :  { %1269 = vmatpush3.bf16.msra.mxu0 %v1266_v20 }
 0x1a2   :  { %1102 = vmatmul.mubr.msk.f32.vlgmr.msra.gmra.mrb[16].mxu0 %vm535_vm5, %v1540_v26 }
 0x275   :  { %v1103_v24 = vpop.f32.mrb[16].mxu0 }
 0x276   :  { %v618_v25 = vadd.f32 %v1103_v24, %v541_v21  ;;  %v608_v27 = vpop.f32.mrb[17].mxu0 }
 0x277   :  { %v617_v28 = vadd.f32 %v608_v27, %v540_v22 }
 0x278   :  { %620 = vst [vmem:[#allocation2 + $0x8] sm:$0xff] %v618_v25 }
 0x279   :  { %619 = vst [vmem:[#allocation2] sm:$0xff] %v617_v28 }
 0x27a PF:  { %v644_v29 = vld [vmem:[#allocation14] sm:$0xff]  ;;  %v645_v30 = vld [vmem:[#allocation14 + $0x8] sm:$0xff]  ;;  %v646_v23 = vld [vmem:[#allocation14 + $0x10] sm:$0xff]  ;;  %s1541_s3 = smov [#allocation16]  }
 0x27b   :  { %v628_v31 = vld [vmem:[#allocation13] sm:$0xff]  ;;  %v1270_v32 = vpack.c.bf16 %v645_v30, %v644_v29  ;;  %v629_v33 = vld [vmem:[#allocation13 + $0x8] sm:$0xff]  ;;  %v647_v34 = vld [vmem:[#allocation14 + $0x18] sm:$0xff]  ;;  %s817_s25 = sshll.u32 %s1541_s3, 4  ;;  %s818_s25 = int_to_ptr.vmem [resolvable:$true] %s817_s25 }
 0x27c   :  { %v1302_v35 = vpack.c.bf16 %v629_v33, %v628_v31  ;;  %v1274_v36 = vpack.c.bf16 %v647_v34, %v646_v23  ;;  %v630_v37 = vld [vmem:[#allocation13 + $0x10] sm:$0xff]  ;;  %v631_v26 = vld [vmem:[#allocation13 + $0x18] sm:$0xff]  ;;  %v648_v38 = vld [vmem:[#allocation14 + $0x20] sm:$0xff]  ;;  %s1495_s16 = scalar_lea.vmem %s818_s25, 256  ;;  %p1500_p1 = scmp.lt.s32.totalorder %s818_s25, %s818_s25 }
 0x27d   :  { %1271 = vmatprep.subr.bf16.mxu1 %v1270_v32  ;;  %v1306_v39 = vpack.c.bf16 %v631_v26, %v630_v37  ;;  %v649_v40 = vld [vmem:[#allocation14 + $0x28] sm:$0xff]  ;;  %v632_v41 = vld [vmem:[#allocation13 + $0x20] sm:$0xff]  ;;  %v650_v45 = vld [vmem:[#allocation14 + $0x30] sm:$0xff]  ;;  %p1496_p0 = scmp.ne.s32.totalorder %s818_s25, %s1495_s16  ;;  %p1501_p2 = scmp.lt.s32.totalorder %s1495_s16, %s1495_s16 }
 0x27e   :  { %v633_v42 = vld [vmem:[#allocation13 + $0x28] sm:$0xff]  ;;  %1303 = vmatprep.subr.bf16.mxu0 %v1302_v35  ;;  %1273 = vmatpush3.bf16.msra.mxu1 %v1270_v32  ;;  %v1278_v43 = vpack.c.bf16 %v649_v40, %v648_v38  ;;  %v651_v46 = vld [vmem:[#allocation14 + $0x38] sm:$0xff]  ;;  %v634_v47 = vld [vmem:[#allocation13 + $0x30] sm:$0xff] }
 0x27f   :  { %1305 = vmatpush3.bf16.msra.mxu0 %v1302_v35  ;;  %1275 = vmatprep.subr.bf16.mxu1 %v1274_v36  ;;  %v1310_v44 = vpack.c.bf16 %v633_v42, %v632_v41  ;;  %v635_v48 = vld [vmem:[#allocation13 + $0x38] sm:$0xff]  ;;  %v1282_v49 = vpack.c.bf16 %v651_v46, %v650_v45  ;;  %v652_v51 = vld [vmem:[#allocation14 + $0x40] sm:$0xff]  ;;  %v653_v52 = vld [vmem:[#allocation14 + $0x48] sm:$0xff]  ;;  %p1502_p3 = por %p1501_p2, %p1500_p1 }
 0x280   :  { %1307 = vmatprep.subr.bf16.mxu0 %v1306_v39  ;;  %v1314_v50 = vpack.c.bf16 %v635_v48, %v634_v47  ;;  %v624_v53 = vld [vmem:[#allocation2] sm:$0xff]  ;;  %v636_v54 = vld [vmem:[#allocation13 + $0x40] sm:$0xff]  ;;  %v637_v55 = vld [vmem:[#allocation13 + $0x48] sm:$0xff]  ;;  %v1286_v57 = vpack.c.bf16 %v653_v52, %v652_v51 }
 0x281   :  { %1136 = vmatprep.mubr.f32.mxu1 %v624_v53  ;;  %v626_v56 = vld [vmem:[%s1759_s7] sm:$0xff]  ;;  %v1318_v58 = vpack.c.bf16 %v637_v55, %v636_v54  ;;  %v655_v60 = vld [vmem:[#allocation14 + $0x58] sm:$0xff]  ;;  %v656_v1 = vld [vmem:[#allocation14 + $0x60] sm:$0xff]  ;;  %p1503_p4 = pnand %p1502_p3, %p1496_p0 }
 0x282   :  { %1277 = vmatpush3.bf16.msra.mxu1 %v1274_v36  ;;  %1171 = vmatprep.mubr.f32.mxu0 %v626_v56  ;;  %v654_v59 = vld [vmem:[#allocation14 + $0x50] sm:$0xff]  ;;  %v639_v62 = vld [vmem:[#allocation13 + $0x58] sm:$0xff]  ;;  %v657_v2 = vld [vmem:[#allocation14 + $0x68] sm:$0xff] }
 0x283   :  { %1309 = vmatpush3.bf16.msra.mxu0 %v1306_v39  ;;  %1279 = vmatprep.subr.bf16.mxu1 %v1278_v43  ;;  %v638_v61 = vld [vmem:[#allocation13 + $0x50] sm:$0xff]  ;;  %v1290_v63 = vpack.c.bf16 %v655_v60, %v654_v59  ;;  %v640_v3 = vld [vmem:[#allocation13 + $0x60] sm:$0xff]  ;;  %v641_v4 = vld [vmem:[#allocation13 + $0x68] sm:$0xff]  ;;  %v1294_v5 = vpack.c.bf16 %v657_v2, %v656_v1 }
 0x284   :  { %1311 = vmatprep.subr.bf16.mxu0 %v1310_v44  ;;  %v1322_v0 = vpack.c.bf16 %v639_v62, %v638_v61  ;;  %v1326_v6 = vpack.c.bf16 %v641_v4, %v640_v3  ;;  %v658_v7 = vld [vmem:[#allocation14 + $0x70] sm:$0xff]  ;;  %v659_v8 = vld [vmem:[#allocation14 + $0x78] sm:$0xff] }
 0x285   :  { %v642_v9 = vld [vmem:[#allocation13 + $0x70] sm:$0xff]  ;;  %v643_v10 = vld [vmem:[#allocation13 + $0x78] sm:$0xff]  ;;  %v1298_v11 = vpack.c.bf16 %v659_v8, %v658_v7 }
 0x286   :  { %1281 = vmatpush3.bf16.msra.mxu1 %v1278_v43  ;;  %v1330_v12 = vpack.c.bf16 %v643_v10, %v642_v9  ;;  %v625_v13 = vld [vmem:[#allocation2 + $0x8] sm:$0xff] }
 0x287   :  { %1313 = vmatpush3.bf16.msra.mxu0 %v1310_v44  ;;  %1283 = vmatprep.subr.bf16.mxu1 %v1282_v49  ;;  %v627_v14 = vld [vmem:[%s1759_s7 + $0x8] sm:$0xff] }
 0x288   :  { %1315 = vmatprep.subr.bf16.mxu0 %v1314_v50 }
 0x28a   :  { %1285 = vmatpush3.bf16.msra.mxu1 %v1282_v49 }
 0x28b   :  { %1317 = vmatpush3.bf16.msra.mxu0 %v1314_v50  ;;  %1287 = vmatprep.subr.bf16.mxu1 %v1286_v57 }
 0x28c   :  { %1319 = vmatprep.subr.bf16.mxu0 %v1318_v58 }
 0x28e   :  { %1289 = vmatpush3.bf16.msra.mxu1 %v1286_v57 }
 0x28f   :  { %1321 = vmatpush3.bf16.msra.mxu0 %v1318_v58  ;;  %1291 = vmatprep.subr.bf16.mxu1 %v1290_v63 }
 0x290   :  { %1323 = vmatprep.subr.bf16.mxu0 %v1322_v0 }
 0x292   :  { %1293 = vmatpush3.bf16.msra.mxu1 %v1290_v63 }
 0x293   :  { %1325 = vmatpush3.bf16.msra.mxu0 %v1322_v0  ;;  %1295 = vmatprep.subr.bf16.mxu1 %v1294_v5 }
 0x294   :  { %1327 = vmatprep.subr.bf16.mxu0 %v1326_v6 }
 0x296   :  { %1297 = vmatpush3.bf16.msra.mxu1 %v1294_v5 }
 0x297   :  { %1329 = vmatpush3.bf16.msra.mxu0 %v1326_v6  ;;  %1299 = vmatprep.subr.bf16.mxu1 %v1298_v11 }
 0x298   :  { %1331 = vmatprep.subr.bf16.mxu0 %v1330_v12 }
 0x29a   :  { %1301 = vmatpush3.bf16.msra.mxu1 %v1298_v11 }
 0x29b   :  { %1333 = vmatpush3.bf16.msra.mxu0 %v1330_v12 }
 0x29d   :  { %1137 = vmatmul.mubr.f32.vlgmr.msra.gmra.mrb[0].mxu1 %v625_v13 }
 0x29e   :  { %1172 = vmatmul.mubr.f32.vlgmr.msra.gmra.mrb[0].mxu0 %v627_v14 }
 0x370   :  { %v1138_v15 = vpop.f32.mrb[0].mxu1 }
 0x371   :  { %v1173_v16 = vpop.f32.mrb[0].mxu0  ;;  %v726_v17 = vpop.f32.mrb[1].mxu1 }
 0x372   :  { %v807_v18 = vadd.f32 %v1173_v16, %v1138_v15  ;;  %v801_v19 = vpop.f32.mrb[1].mxu0 }
 0x373   :  { %v802_v20 = vadd.f32 %v801_v19, %v726_v17 }
 0x374   :  { %811 = vst [vmem:[#allocation16 + $0x8] sm:$0xff] %v807_v18 }
 0x375   :  { %810 = vst [vmem:[#allocation16] sm:$0xff] %v802_v20 }
 0x376   :  { %1506 = shalt.err (!%p1503_p4)
}
 0x377   :  { %s1507_s18 = scalar_lea.hbm %s1762_s10, 256 }
 0x378   :  { %p1508_p5 = scmp.ne.s32.totalorder %s1762_s10, %s1507_s18  ;;  %p1511_p6 = scmp.lt.u32.totalorder %s1507_s18, %s1762_s10 }
 0x37a   :  { %p1513_p7 = pnand %p1511_p6, %p1508_p5 }
 0x37c   :  { %1516 = shalt.err (!%p1513_p7)
}
 0x37d   :  { %823 = dma.vmem_to_hbm [thread:$0]  %s818_s25, 256, %s1762_s10, [#allocation7], %s1532_s29, %s1532_s29, %s1533_s30  }
 0x37e   :  { %1527 = dma.done.wait [#allocation7], 256  }
 0x37f   :  { %1528 = vsyncadd [#allocation7], 4294967040 }
 0x380   :  { %827 = vsyncpa [#allocation6], 1 }
 0x381   :  { %828 = vsyncpa [#allocation9], 1 }
 0x382   :  { %829 = vsyncpa [#allocation12], 1 }
 0x383   :  { %830 = vsyncpa [#allocation15], 1 }
 0x384   :  { %831 = vsyncpa [#allocation7], 1 }

</bundles_post_ra>
